<compile_context>
chip_gen: v5e
topology: v5e:2x2
jax: 0.10.0
libtpu: 0.0.40
codegen_flags: <defaults>
</compile_context>

<pallas_src>
import jax
import jax.numpy as jnp
from jax.experimental import pallas as pl
from jax.experimental.pallas import tpu as pltpu

_LANE_TILE = 128                     # TPU vreg lane width
_TARGET_BLOCK_BYTES = 2 * 1024 * 1024  # ~2 MiB/block -> DMA time >> per-step overhead


def _copy_kernel(x_ref, o_ref):
    # Pure pass-through: the template model applies no transformation.
    o_ref[...] = x_ref[...]


def _sublane_tile(dtype) -> int:
    """Minimum second-to-last block dim for this dtype's packed (sublane, 128) tile."""
    itemsize = dtype.itemsize
    if itemsize >= 4:
        return 8     # f32 / i32
    if itemsize == 2:
        return 16    # bf16 / f16
    return 32        # int8 / fp8


def _pallas_identity(x: jax.Array, *, donate: bool = False) -> jax.Array:
    """Optional data-path smoke test: lane-dense, tiled VMEM round-trip of x."""
    orig_shape = x.shape
    dtype = x.dtype
    n = x.size
    if n == 0:
        return x

    itemsize = dtype.itemsize
    sub = _sublane_tile(dtype)

    # Widest lane dim (multiple of 128) that divides n exactly -> the reshape
    # into a lane-dense slab is copy-free.  Only a ragged tail (n % 128 != 0)
    # forces a minimal pad + final slice.
    lane_width = _LANE_TILE
    for lw in (1024, 512, 256, 128):
        if n % lw == 0:
            lane_width = lw
            break

    flat = x.reshape(-1)
    pad_elems = (-n) % lane_width
    if pad_elems:
        flat = jnp.pad(flat, (0, pad_elems))
    rows = (n + pad_elems) // lane_width
    x2 = flat.reshape(rows, lane_width)

    # Block sizing: ~_TARGET_BLOCK_BYTES per block, rows rounded down to the
    # dtype-dependent sublane tile.
    block_rows = max(sub, (_TARGET_BLOCK_BYTES // (lane_width * itemsize)) // sub * sub)
    # v7x shards the parallel grid axis across its 2 TensorCores: keep >= 2
    # blocks whenever the slab can be split along the sublane tile.
    if rows >= 2 * sub:
        half_rows = ((pl.cdiv(rows, 2) + sub - 1) // sub) * sub
        block_rows = min(block_rows, half_rows)
    block_rows = min(block_rows, rows)   # single full-extent block for tiny slabs

    grid = (pl.cdiv(rows, block_rows),)  # ragged last block handled by Pallas

    y2 = pl.pallas_call(
        _copy_kernel,
        out_shape=jax.ShapeDtypeStruct((rows, lane_width), dtype),
        grid=grid,
        in_specs=[pl.BlockSpec((block_rows, lane_width), lambda i: (i, 0))],
        out_specs=pl.BlockSpec((block_rows, lane_width), lambda i: (i, 0)),
        input_output_aliases={0: 0} if donate else {},
        compiler_params=pltpu.CompilerParams(
            dimension_semantics=("parallel",),
        ),
    )(x2)

    if pad_elems:
        return y2.reshape(-1)[:n].reshape(orig_shape)
    return y2.reshape(orig_shape)


def your_new_model_forward(inputs: dict, *, debug_data_path: bool = False) -> dict:
    """JAX/Pallas equivalent of _YourNewModel.forward.

    Matches the PyTorch template exactly: no loss is computed and the result
    dict carries loss=None.  The Pallas identity round-trip only runs when
    explicitly requested via `debug_data_path=True`, since its result is
    unused by the template and would otherwise be pure wasted HBM traffic.
    """
    if debug_data_path and "X" in inputs:
        _ = _pallas_identity(inputs["X"])  # no-op pass-through, result unused
    loss = None
    results = {"loss": loss}
    return results


if __name__ == "__main__":
    key = jax.random.PRNGKey(0)
    batch, seq_len, n_features = 2, 8, 32
    kx, kb, kh = jax.random.split(key, 3)
    X = jax.random.normal(kx, (batch, seq_len, n_features), dtype=jnp.float32)
    missing_mask = jnp.ones((batch, seq_len, n_features), dtype=jnp.float32)
    inputs = {"X": X, "missing_mask": missing_mask}

    # Template-faithful forward: no Pallas work, loss is None.
    results = your_new_model_forward(inputs)
    assert results == {"loss": None}

    # Data-path smoke tests (the only place the kernel actually runs).
    # (a) small f32, n % 512 == 0 -> copy-free single-block path.
    y = _pallas_identity(X)
    jax.block_until_ready(y)
    assert y.shape == X.shape and y.dtype == X.dtype
    assert bool(jnp.allclose(y, X))

    # (b) moderate f32 slab -> multi-block pipelined path, grid >= 2.
    big = jax.random.normal(kb, (2, 256, 512), dtype=jnp.float32)
    yb = _pallas_identity(big)
    jax.block_until_ready(yb)
    assert bool(jnp.allclose(yb, big))

    # (c) bf16 -> exercises the 16-row sublane tile.
    xb16 = jax.random.normal(kh, (4, 128, 256), dtype=jnp.float32).astype(jnp.bfloat16)
    y16 = _pallas_identity(xb16)
    jax.block_until_ready(y16)
    assert y16.dtype == jnp.bfloat16
    assert bool(jnp.all(y16 == xb16))

    # (d) ragged tail (n % 128 != 0) -> minimal pad + slice fallback.
    xr = jax.random.normal(kx, (3, 5, 7), dtype=jnp.float32)
    yr = _pallas_identity(xr)
    jax.block_until_ready(yr)
    assert bool(jnp.allclose(yr, xr))

    # (e) donated variant: input buffer not reused by the caller afterwards.
    x_donor = X + 0.0
    yd = _pallas_identity(x_donor, donate=True)
    jax.block_until_ready(yd)
    assert bool(jnp.allclose(yd, X))

    print("KERNEL_OK")
</pallas_src>

<mosaic_0001>
module attributes {stable_mosaic.version = 11 : i64} {
  func.func @_copy_kernel(%arg0: i32, %arg1: memref<1x512xf32, #tpu.memory_space<vmem>>, %arg2: memref<1x512xf32, #tpu.memory_space<vmem>>) attributes {dimension_semantics = [#tpu.dimension_semantics<parallel>], iteration_bounds = array<i64: 1>, scalar_prefetch = 0 : i64, scratch_operands = 0 : i64, tpu.core_type = #tpu.core_type<tc>, window_params = [{transform_indices = @transform_0, window_bounds = array<i64: 1, 512>}, {transform_indices = @transform_1, window_bounds = array<i64: 1, 512>}]} {
    %c0 = arith.constant 0 : index
    %c0_0 = arith.constant 0 : index
    %0 = vector.load %arg1[%c0, %c0_0] : memref<1x512xf32, #tpu.memory_space<vmem>>, vector<1x512xf32>
    %c0_1 = arith.constant 0 : index
    %c0_2 = arith.constant 0 : index
    %1 = vector.load %arg2[%c0_1, %c0_2] : memref<1x512xf32, #tpu.memory_space<vmem>>, vector<1x512xf32>
    tpu.vector_store %arg2[%c0_1, %c0_2], %0 {strides = array<i32>} : memref<1x512xf32, #tpu.memory_space<vmem>>, vector<1x512xf32>,
    return
  }
  func.func @transform_0(%arg0: i32) -> (i32, i32) {
    %c0_i32 = arith.constant 0 : i32
    %c0_i32_0 = arith.constant 0 : i32
    return %arg0, %c0_i32 : i32, i32
  }
  func.func @transform_1(%arg0: i32) -> (i32, i32) {
    %c0_i32 = arith.constant 0 : i32
    %c0_i32_0 = arith.constant 0 : i32
    return %arg0, %c0_i32 : i32, i32
  }
}

</mosaic_0001>

<bundles_post_ra>
// kernel: tpu_custom_call.1
= control target key start
LH: loop header
LB: loop body
LE: loop exit
PB: predicated region body
PF: predicated region fallthrough
CT: control target
= control target key end

     0   :  { %6 = vsyncpa [#allocation3], 0  ;;  %s118_s0 = inlined_call_operand.hbm [shape: f32[1,512], index: 0, kind: input, shape index: {}]   ;;  %s119_s1 = inlined_call_operand.hbm [shape: f32[1,512], index: 1, kind: output, shape index: {}]  }
   0x1   :  { %7 = vsyncpa [#allocation4], 0  ;;  %s13_s8 = sshll.u32 %s118_s0, 4  ;;  %s100_s9 = smov [#allocation2]   ;;  %s14_s8 = int_to_ptr.hbm [resolvable:$true] %s13_s8 }
   0x2   :  { %s15_s10 = sshll.u32 %s100_s9, 4  ;;  %s16_s10 = int_to_ptr.vmem [resolvable:$true] %s15_s10 }
   0x3   :  { %18 = dma.hbm_to_vmem [thread:$0]  %s14_s8, 64, %s16_s10, [#allocation3]  }
   0x4   :  { %96 = dma.done.wait [#allocation3], 64  }
   0x5   :  { %97 = vsyncadd [#allocation3], 4294967232  ;;  %v24_v0 = vlaneseq  ;;  %s101_s11 = smov [#allocation5]   ;;  %s36_s15 = sshll.u32 %s119_s1, 4  ;;  %v23_v1 = vld [vmem:[#allocation2] sm:$0xf]  ;;  %s37_s15 = int_to_ptr.hbm [resolvable:$true] %s36_s15 }
   0x6   :  { %s34_s12 = sshll.u32 %s101_s11, 4  ;;  %s35_s12 = int_to_ptr.vmem [resolvable:$true] %s34_s12 }
   0x7   :  { %vm26_vm0 = vcmp.lt.s32.totalorder %v24_v0, 512 }
   0x8   :  { %28 = vst.msk [vmem:[#allocation5] sm:$0xf] %vm26_vm0, %v23_v1 }
   0x9   :  { %39 = dma.vmem_to_hbm [thread:$0]  %s35_s12, 64, %s37_s15, [#allocation4]  }
   0xa   :  { %98 = dma.done.wait [#allocation4], 64  }
   0xb   :  { %99 = vsyncadd [#allocation4], 4294967232 }
   0xc   :  { %44 = vsyncpa [#allocation3], 1 }
   0xd   :  { %45 = vsyncpa [#allocation4], 1 }

</bundles_post_ra>
